<compile_context>
chip_gen: v5e
topology: v5e:2x2
jax: 0.10.0
libtpu: 0.0.40
codegen_flags: <defaults>
</compile_context>

<pallas_src>
import functools

import numpy as np
import jax
import jax.numpy as jnp
from jax import lax
from jax.experimental import pallas as pl
from jax.experimental.pallas import tpu as pltpu


def _pool_kernel(x_ref, halo_ref, out_ref, idx_ref, eo_ref, oe_ref, oo_ref, *,
                 TH, H, W, H_out, W_out, acc_dtype):
    """One (batch, channel-tile, output-row-tile) step, NHWC layout.

    x_ref    : (2*TH, W, TC)        input rows [2*TH*t, 2*TH*(t+1)) of one (n, c-tile)
    halo_ref : (1, W, TC)           input row 2*TH*t - 1 (clamped to row 0 at t == 0)
    out_ref  : (TH, W_out, TC)      pooled values
    idx_ref  : (TH, W_out, TC)      int32 flat h*W + w argmax indices
    eo_ref   : (TH,   W_out+1, TC)  even rows, odd cols, -inf column pads
    oe_ref   : (TH+1, W_out,   TC)  odd rows (halo at slot 0), even cols
    oo_ref   : (TH+1, W_out+1, TC)  odd rows (halo at slot 0), odd cols, -inf pads
    """
    t = pl.program_id(2)
    TC = out_ref.shape[-1]
    n_odd = W // 2                        # number of in-bounds odd input columns
    NEG = jnp.array(-jnp.inf, dtype=acc_dtype)

    # ---- parity extracts into boundary-extended scratch planes ---------------
    # Each input element is read from the VMEM block exactly once; every padded
    # boundary tap becomes a -inf slot, so the 9-tap scan below needs no masks.
    eo_ref[:, 0:1, :] = jnp.full((TH, 1, TC), -jnp.inf, acc_dtype)
    eo_ref[:, 1:1 + n_odd, :] = x_ref[
        pl.ds(0, TH, stride=2), pl.ds(1, n_odd, stride=2), :].astype(acc_dtype)

    oe_ref[1:TH + 1, :, :] = x_ref[
        pl.ds(1, TH, stride=2), pl.ds(0, W_out, stride=2), :].astype(acc_dtype)

    oo_ref[:, 0:1, :] = jnp.full((TH + 1, 1, TC), -jnp.inf, acc_dtype)
    oo_ref[1:TH + 1, 1:1 + n_odd, :] = x_ref[
        pl.ds(1, TH, stride=2), pl.ds(1, n_odd, stride=2), :].astype(acc_dtype)

    if W % 2:                             # odd W: input column W is the right pad
        eo_ref[:, W_out:W_out + 1, :] = jnp.full((TH, 1, TC), -jnp.inf, acc_dtype)
        oo_ref[:, W_out:W_out + 1, :] = jnp.full((TH + 1, 1, TC), -jnp.inf, acc_dtype)

    # Halo row (global input row 2*TH*t - 1); at t == 0 it is the top pad row.
    top_ok = t > 0
    halo_e = halo_ref[0:1, pl.ds(0, W_out, stride=2), :].astype(acc_dtype)
    halo_o = halo_ref[0:1, pl.ds(1, n_odd, stride=2), :].astype(acc_dtype)
    oe_ref[0:1, :, :] = jnp.where(top_ok, halo_e, NEG)
    oo_ref[0:1, 1:1 + n_odd, :] = jnp.where(top_ok, halo_o, NEG)

    if H % 2:
        # Odd H: global input row H (== 2*(H_out-1) + 1) is the bottom pad row.
        # It lands in odd-row scratch slot r of the last row tile, and only that
        # slot can feed a *kept* output row, so -inf just that one row.
        r = H_out - TH * t

        @pl.when(jnp.logical_and(r >= 1, r <= TH))
        def _():
            oe_ref[pl.ds(r, 1), :, :] = jnp.full((1, W_out, TC), -jnp.inf, acc_dtype)
            oo_ref[pl.ds(r, 1), :, :] = jnp.full((1, W_out + 1, TC), -jnp.inf, acc_dtype)

    # ---- 9-tap scan in PyTorch's row-major window order (first max wins) -----
    # NOTE: unlike PyTorch, NaN inputs are never selected (`v > best_v` is False
    # for NaN), and an all-(-inf) window returns the unclipped top-left index.
    shape = (TH, W_out, TC)
    best_v = jnp.full(shape, -jnp.inf, dtype=acc_dtype)
    best_c = jnp.zeros(shape, dtype=jnp.int32)
    for di in range(3):
        for dj in range(3):
            if di == 1 and dj == 1:
                v = x_ref[pl.ds(0, TH, stride=2),
                          pl.ds(0, W_out, stride=2), :].astype(acc_dtype)
            elif di == 1:                              # even row, shifted odd col
                c0 = dj // 2
                v = eo_ref[:, c0:c0 + W_out, :]
            elif dj == 1:                              # shifted odd row, even col
                r0 = di // 2
                v = oe_ref[r0:r0 + TH, :, :]
            else:                                      # shifted odd row & odd col
                r0, c0 = di // 2, dj // 2
                v = oo_ref[r0:r0 + TH, c0:c0 + W_out, :]
            take = v > best_v
            best_c = jnp.where(take, di * W + dj, best_c)   # splat constant only
            best_v = jnp.where(take, v, best_v)

    # Flat h*W + w index: base = index of the window's (di=0, dj=0) position,
    # added once; each tap contributed only its constant offset di*W + dj.
    oh = lax.broadcasted_iota(jnp.int32, (TH, W_out, 1), 0)
    ow = lax.broadcasted_iota(jnp.int32, (TH, W_out, 1), 1)
    base = oh * (2 * W) + ow * 2 + (t * (2 * TH * W) - W - 1)

    out_ref[...] = best_v.astype(out_ref.dtype)
    idx_ref[...] = base + best_c


def _device_kind():
    try:
        return jax.devices()[0].device_kind.lower()
    except Exception:
        return ""


def max_pool_argmax_nhwc(x, _row_tile=None):
    """3x3 / stride 2 / pad 1 max-pool with argmax on an NHWC array.

    Returns (values (N, H_out, W_out, C), int32 indices = h*W + w).
    """
    N, H, W, C = x.shape
    if H < 2 or W < 2:
        raise NotImplementedError("H and W must be >= 2 for this kernel")
    assert H * W < 2 ** 31, "flat h*W+w indices are computed in int32"
    H_out = (H + 2 - 3) // 2 + 1
    W_out = (W + 2 - 3) // 2 + 1

    kind = _device_kind()
    is_v7 = "v7" in kind
    is_v5 = "v5" in kind

    # Keep bf16 in bf16 on v6e/v7x (native bf16 VALU); upcast on v5e and for
    # everything else.
    if x.dtype == jnp.float32:
        acc_dtype = jnp.float32
    elif x.dtype == jnp.bfloat16:
        acc_dtype = jnp.float32 if is_v5 else jnp.bfloat16
    else:
        acc_dtype = jnp.float32

    # Tiling: channels on the 128-lane axis; the row tile targets ~4 MiB
    # double-buffered input blocks on v5e/v6e (128 MiB physical VMEM) and
    # ~2 MiB on v7x (64 MiB physical VMEM + several live full-plane temps).
    TC = C if C <= 128 else 128
    itemsize = np.dtype(x.dtype).itemsize
    target_block_bytes = (2 if is_v7 else 4) * 1024 * 1024
    vmem_limit = (32 if is_v7 else 48) * 1024 * 1024
    bytes_per_out_row = 2 * W * TC * itemsize
    TH = max(1, min(H_out, target_block_bytes // max(1, bytes_per_out_row)))
    if _row_tile is not None:                      # test/override hook
        TH = max(1, min(int(_row_tile), H_out))
    n_ct = pl.cdiv(C, TC)
    n_rt = pl.cdiv(H_out, TH)

    kernel = functools.partial(_pool_kernel, TH=TH, H=H, W=W,
                               H_out=H_out, W_out=W_out, acc_dtype=acc_dtype)

    grid_spec = pltpu.PrefetchScalarGridSpec(
        num_scalar_prefetch=0,
        grid=(N, n_ct, n_rt),
        in_specs=[
            # main 2*TH-row input block of one (n, channel-tile)
            pl.BlockSpec((None, 2 * TH, W, TC), lambda n, c, t: (n, t, 0, c)),
            # 1-row top halo: input row 2*TH*t - 1 (clamped at 0; -inf at t == 0)
            pl.BlockSpec((None, 1, W, TC),
                         lambda n, c, t: (n, jnp.maximum(2 * TH * t - 1, 0), 0, c)),
        ],
        out_specs=[
            pl.BlockSpec((None, TH, W_out, TC), lambda n, c, t: (n, t, 0, c)),
            pl.BlockSpec((None, TH, W_out, TC), lambda n, c, t: (n, t, 0, c)),
        ],
        scratch_shapes=[
            pltpu.VMEM((TH, W_out + 1, TC), acc_dtype),      # even rows, odd cols
            pltpu.VMEM((TH + 1, W_out, TC), acc_dtype),      # odd rows, even cols
            pltpu.VMEM((TH + 1, W_out + 1, TC), acc_dtype),  # odd rows, odd cols
        ],
    )

    out, idx = pl.pallas_call(
        kernel,
        out_shape=(jax.ShapeDtypeStruct((N, H_out, W_out, C), x.dtype),
                   jax.ShapeDtypeStruct((N, H_out, W_out, C), jnp.int32)),
        grid_spec=grid_spec,
        compiler_params=pltpu.CompilerParams(
            # no cross-step state -> every grid axis may be split across cores
            dimension_semantics=("parallel", "parallel", "parallel"),
            vmem_limit_bytes=vmem_limit),
    )(x, x)                                         # same array feeds block + halo
    return out, idx


def max_pooling_with_argmax_2d(x_nchw, kernel_size=3, stride=2, padding=1,
                               _row_tile=None):
    """PyTorch-compatible wrapper: NCHW in, (NCHW values, NCHW flat-HW indices) out."""
    if (kernel_size, stride, padding) != (3, 2, 1):
        raise NotImplementedError(
            "Pallas kernel implements the module defaults "
            "(kernel_size=3, stride=2, padding=1)")
    x = jnp.transpose(x_nchw, (0, 2, 3, 1))          # NCHW -> NHWC
    out, idx = max_pool_argmax_nhwc(x, _row_tile=_row_tile)
    outputs = jnp.transpose(out, (0, 3, 1, 2))       # back to NCHW
    indices = jnp.transpose(idx, (0, 3, 1, 2))
    if jax.config.jax_enable_x64:                    # match torch int64 only if x64 on
        indices = indices.astype(jnp.int64)
    return outputs, indices


def _reference_numpy(x, K=3, s=2, p=1):
    N, C, H, W = x.shape
    Ho = (H + 2 * p - K) // s + 1
    Wo = (W + 2 * p - K) // s + 1
    out = np.zeros((N, C, Ho, Wo), np.float32)
    idx = np.zeros((N, C, Ho, Wo), np.int64)
    for n in range(N):
        for c in range(C):
            for oh in range(Ho):
                for ow in range(Wo):
                    best = -np.inf
                    bi = 0
                    for di in range(K):
                        for dj in range(K):
                            h = oh * s + di - p
                            w = ow * s + dj - p
                            if 0 <= h < H and 0 <= w < W:
                                v = x[n, c, h, w]
                                if v > best:
                                    best = v
                                    bi = h * W + w
                    out[n, c, oh, ow] = best
                    idx[n, c, oh, ow] = bi
    return out, idx


if __name__ == "__main__":
    root = jax.random.PRNGKey(0)

    # Main check: the module-sized small shape.
    x = jax.random.normal(root, (2, 4, 16, 16), dtype=jnp.float32)
    outputs, indices = max_pooling_with_argmax_2d(x, kernel_size=3, stride=2, padding=1)
    jax.block_until_ready((outputs, indices))

    assert outputs.shape == (2, 4, 8, 8) and indices.shape == (2, 4, 8, 8)
    assert outputs.dtype == jnp.float32
    assert indices.dtype in (jnp.int32, jnp.int64)

    ref_out, ref_idx = _reference_numpy(np.asarray(x))
    np.testing.assert_allclose(np.asarray(outputs), ref_out, rtol=1e-6, atol=1e-6)
    np.testing.assert_array_equal(np.asarray(indices), ref_idx)

    # Extra checks: multiple row tiles (exercises the 1-row halo BlockSpec) and
    # odd H/W (exercises the -inf boundary pads and partial tiles), small shapes.
    extra_cases = [
        ((1, 3, 16, 20), 2),    # even dims, 4 row tiles per (n, c)
        ((1, 5, 15, 17), 3),    # odd H and W, partial last row tile
        ((1, 2, 9, 7), None),   # odd H and W, single row tile
    ]
    for i, (shape, row_tile) in enumerate(extra_cases):
        xk = jax.random.normal(jax.random.fold_in(root, i + 1), shape,
                               dtype=jnp.float32)
        o, ind = max_pooling_with_argmax_2d(xk, _row_tile=row_tile)
        jax.block_until_ready((o, ind))
        r_out, r_idx = _reference_numpy(np.asarray(xk))
        np.testing.assert_allclose(np.asarray(o), r_out, rtol=1e-6, atol=1e-6)
        np.testing.assert_array_equal(np.asarray(ind), r_idx)

    print("KERNEL_OK")
</pallas_src>

<mosaic_0001>
module attributes {stable_mosaic.version = 11 : i64} {
  func.func @_pool_kernel(%arg0: i32, %arg1: i32, %arg2: i32, %arg3: memref<1x16x16x4xf32, #tpu.memory_space<vmem>>, %arg4: memref<1x1x16x4xf32, #tpu.memory_space<vmem>>, %arg5: memref<1x8x8x4xf32, #tpu.memory_space<vmem>>, %arg6: memref<1x8x8x4xi32, #tpu.memory_space<vmem>>, %arg7: memref<8x9x4xf32, #tpu.memory_space<vmem>>, %arg8: memref<9x8x4xf32, #tpu.memory_space<vmem>>, %arg9: memref<9x9x4xf32, #tpu.memory_space<vmem>>) attributes {dimension_semantics = [#tpu.dimension_semantics<parallel>, #tpu.dimension_semantics<parallel>, #tpu.dimension_semantics<parallel>], iteration_bounds = array<i64: 2, 1, 1>, scalar_prefetch = 0 : i64, scratch_operands = 3 : i64, tpu.core_type = #tpu.core_type<tc>, window_params = [{transform_indices = @transform_0, window_bounds = array<i64: 1, 16, 16, 4>}, {transform_indices = @transform_1, window_bounds = array<i64: 1, 1, 16, 4>}, {transform_indices = @transform_2, window_bounds = array<i64: 1, 8, 8, 4>}, {transform_indices = @transform_3, window_bounds = array<i64: 1, 8, 8, 4>}]} {
    %cst = arith.constant 0xFF800000 : f32
    %0 = vector.broadcast %cst : f32 to vector<8x1x4xf32>
    %c0 = arith.constant 0 : index
    %c0_0 = arith.constant 0 : index
    %c0_1 = arith.constant 0 : index
    %1 = vector.load %arg7[%c0, %c0_0, %c0_1] : memref<8x9x4xf32, #tpu.memory_space<vmem>>, vector<8x1x4xf32>
    tpu.vector_store %arg7[%c0, %c0_0, %c0_1], %0 {strides = array<i32>} : memref<8x9x4xf32, #tpu.memory_space<vmem>>, vector<8x1x4xf32>,
    %c0_2 = arith.constant 0 : index
    %c0_3 = arith.constant 0 : index
    %c1 = arith.constant 1 : index
    %c0_4 = arith.constant 0 : index
    %2 = tpu.strided_load %arg3[%c0_2, %c0_3, %c1, %c0_4] {strides = array<i32: 1, 2, 2, 1>} : memref<1x16x16x4xf32, #tpu.memory_space<vmem>>, vector<1x8x8x4xf32>
    %3 = vector.shape_cast %2 : vector<1x8x8x4xf32> to vector<8x8x4xf32>
    %c0_5 = arith.constant 0 : index
    %c1_6 = arith.constant 1 : index
    %c0_7 = arith.constant 0 : index
    %4 = vector.load %arg7[%c0_5, %c1_6, %c0_7] : memref<8x9x4xf32, #tpu.memory_space<vmem>>, vector<8x8x4xf32>
    tpu.vector_store %arg7[%c0_5, %c1_6, %c0_7], %3 {strides = array<i32>} : memref<8x9x4xf32, #tpu.memory_space<vmem>>, vector<8x8x4xf32>,
    %c0_8 = arith.constant 0 : index
    %c1_9 = arith.constant 1 : index
    %c0_10 = arith.constant 0 : index
    %c0_11 = arith.constant 0 : index
    %5 = tpu.strided_load %arg3[%c0_8, %c1_9, %c0_10, %c0_11] {strides = array<i32: 1, 2, 2, 1>} : memref<1x16x16x4xf32, #tpu.memory_space<vmem>>, vector<1x8x8x4xf32>
    %6 = vector.shape_cast %5 : vector<1x8x8x4xf32> to vector<8x8x4xf32>
    %c1_12 = arith.constant 1 : index
    %c0_13 = arith.constant 0 : index
    %c0_14 = arith.constant 0 : index
    %7 = vector.load %arg8[%c1_12, %c0_13, %c0_14] : memref<9x8x4xf32, #tpu.memory_space<vmem>>, vector<8x8x4xf32>
    tpu.vector_store %arg8[%c1_12, %c0_13, %c0_14], %6 {strides = array<i32>} : memref<9x8x4xf32, #tpu.memory_space<vmem>>, vector<8x8x4xf32>,
    %cst_15 = arith.constant 0xFF800000 : f32
    %8 = vector.broadcast %cst_15 : f32 to vector<9x1x4xf32>
    %c0_16 = arith.constant 0 : index
    %c0_17 = arith.constant 0 : index
    %c0_18 = arith.constant 0 : index
    %9 = vector.load %arg9[%c0_16, %c0_17, %c0_18] : memref<9x9x4xf32, #tpu.memory_space<vmem>>, vector<9x1x4xf32>
    tpu.vector_store %arg9[%c0_16, %c0_17, %c0_18], %8 {strides = array<i32>} : memref<9x9x4xf32, #tpu.memory_space<vmem>>, vector<9x1x4xf32>,
    %c0_19 = arith.constant 0 : index
    %c1_20 = arith.constant 1 : index
    %c1_21 = arith.constant 1 : index
    %c0_22 = arith.constant 0 : index
    %10 = tpu.strided_load %arg3[%c0_19, %c1_20, %c1_21, %c0_22] {strides = array<i32: 1, 2, 2, 1>} : memref<1x16x16x4xf32, #tpu.memory_space<vmem>>, vector<1x8x8x4xf32>
    %11 = vector.shape_cast %10 : vector<1x8x8x4xf32> to vector<8x8x4xf32>
    %c1_23 = arith.constant 1 : index
    %c1_24 = arith.constant 1 : index
    %c0_25 = arith.constant 0 : index
    %12 = vector.load %arg9[%c1_23, %c1_24, %c0_25] : memref<9x9x4xf32, #tpu.memory_space<vmem>>, vector<8x8x4xf32>
    tpu.vector_store %arg9[%c1_23, %c1_24, %c0_25], %11 {strides = array<i32>} : memref<9x9x4xf32, #tpu.memory_space<vmem>>, vector<8x8x4xf32>,
    %c0_i32 = arith.constant 0 : i32
    %13 = arith.cmpi sgt, %arg2, %c0_i32 : i32
    %c0_26 = arith.constant 0 : index
    %c0_27 = arith.constant 0 : index
    %c0_28 = arith.constant 0 : index
    %c0_29 = arith.constant 0 : index
    %14 = tpu.strided_load %arg4[%c0_26, %c0_27, %c0_28, %c0_29] {strides = array<i32: 1, 1, 2, 1>} : memref<1x1x16x4xf32, #tpu.memory_space<vmem>>, vector<1x1x8x4xf32>
    %15 = vector.shape_cast %14 : vector<1x1x8x4xf32> to vector<1x8x4xf32>
    %c0_30 = arith.constant 0 : index
    %c0_31 = arith.constant 0 : index
    %c1_32 = arith.constant 1 : index
    %c0_33 = arith.constant 0 : index
    %16 = tpu.strided_load %arg4[%c0_30, %c0_31, %c1_32, %c0_33] {strides = array<i32: 1, 1, 2, 1>} : memref<1x1x16x4xf32, #tpu.memory_space<vmem>>, vector<1x1x8x4xf32>
    %17 = vector.shape_cast %16 : vector<1x1x8x4xf32> to vector<1x8x4xf32>
    %cst_34 = arith.constant 0xFF800000 : f32
    %18 = vector.broadcast %cst_34 : f32 to vector<1x8x4xf32>
    %19 = arith.select %13, %15, %18 : vector<1x8x4xf32>
    %c0_35 = arith.constant 0 : index
    %c0_36 = arith.constant 0 : index
    %c0_37 = arith.constant 0 : index
    %20 = vector.load %arg8[%c0_35, %c0_36, %c0_37] : memref<9x8x4xf32, #tpu.memory_space<vmem>>, vector<1x8x4xf32>
    tpu.vector_store %arg8[%c0_35, %c0_36, %c0_37], %19 {strides = array<i32>} : memref<9x8x4xf32, #tpu.memory_space<vmem>>, vector<1x8x4xf32>,
    %cst_38 = arith.constant 0xFF800000 : f32
    %21 = vector.broadcast %cst_38 : f32 to vector<1x8x4xf32>
    %22 = arith.select %13, %17, %21 : vector<1x8x4xf32>
    %c0_39 = arith.constant 0 : index
    %c1_40 = arith.constant 1 : index
    %c0_41 = arith.constant 0 : index
    %23 = vector.load %arg9[%c0_39, %c1_40, %c0_41] : memref<9x9x4xf32, #tpu.memory_space<vmem>>, vector<1x8x4xf32>
    tpu.vector_store %arg9[%c0_39, %c1_40, %c0_41], %22 {strides = array<i32>} : memref<9x9x4xf32, #tpu.memory_space<vmem>>, vector<1x8x4xf32>,
    %cst_42 = arith.constant 0xFF800000 : f32
    %24 = vector.broadcast %cst_42 : f32 to vector<8x8x4xf32>
    %c0_i32_43 = arith.constant 0 : i32
    %25 = vector.broadcast %c0_i32_43 : i32 to vector<8x8x4xi32>
    %c0_44 = arith.constant 0 : index
    %c0_45 = arith.constant 0 : index
    %c0_46 = arith.constant 0 : index
    %26 = vector.load %arg9[%c0_44, %c0_45, %c0_46] : memref<9x9x4xf32, #tpu.memory_space<vmem>>, vector<8x8x4xf32>
    %27 = arith.cmpf ogt, %26, %24 : vector<8x8x4xf32>
    %c0_i32_47 = arith.constant 0 : i32
    %28 = vector.broadcast %c0_i32_47 : i32 to vector<8x8x4xi32>
    %29 = arith.select %27, %28, %25 : vector<8x8x4xi1>, vector<8x8x4xi32>
    %30 = arith.select %27, %26, %24 : vector<8x8x4xi1>, vector<8x8x4xf32>
    %c0_48 = arith.constant 0 : index
    %c0_49 = arith.constant 0 : index
    %c0_50 = arith.constant 0 : index
    %31 = vector.load %arg8[%c0_48, %c0_49, %c0_50] : memref<9x8x4xf32, #tpu.memory_space<vmem>>, vector<8x8x4xf32>
    %32 = arith.cmpf ogt, %31, %30 : vector<8x8x4xf32>
    %c1_i32 = arith.constant 1 : i32
    %33 = vector.broadcast %c1_i32 : i32 to vector<8x8x4xi32>
    %34 = arith.select %32, %33, %29 : vector<8x8x4xi1>, vector<8x8x4xi32>
    %35 = arith.select %32, %31, %30 : vector<8x8x4xi1>, vector<8x8x4xf32>
    %c0_51 = arith.constant 0 : index
    %c1_52 = arith.constant 1 : index
    %c0_53 = arith.constant 0 : index
    %36 = vector.load %arg9[%c0_51, %c1_52, %c0_53] : memref<9x9x4xf32, #tpu.memory_space<vmem>>, vector<8x8x4xf32>
    %37 = arith.cmpf ogt, %36, %35 : vector<8x8x4xf32>
    %c2_i32 = arith.constant 2 : i32
    %38 = vector.broadcast %c2_i32 : i32 to vector<8x8x4xi32>
    %39 = arith.select %37, %38, %34 : vector<8x8x4xi1>, vector<8x8x4xi32>
    %40 = arith.select %37, %36, %35 : vector<8x8x4xi1>, vector<8x8x4xf32>
    %c0_54 = arith.constant 0 : index
    %c0_55 = arith.constant 0 : index
    %c0_56 = arith.constant 0 : index
    %41 = vector.load %arg7[%c0_54, %c0_55, %c0_56] : memref<8x9x4xf32, #tpu.memory_space<vmem>>, vector<8x8x4xf32>
    %42 = arith.cmpf ogt, %41, %40 : vector<8x8x4xf32>
    %c16_i32 = arith.constant 16 : i32
    %43 = vector.broadcast %c16_i32 : i32 to vector<8x8x4xi32>
    %44 = arith.select %42, %43, %39 : vector<8x8x4xi1>, vector<8x8x4xi32>
    %45 = arith.select %42, %41, %40 : vector<8x8x4xi1>, vector<8x8x4xf32>
    %c0_57 = arith.constant 0 : index
    %c0_58 = arith.constant 0 : index
    %c0_59 = arith.constant 0 : index
    %c0_60 = arith.constant 0 : index
    %46 = tpu.strided_load %arg3[%c0_57, %c0_58, %c0_59, %c0_60] {strides = array<i32: 1, 2, 2, 1>} : memref<1x16x16x4xf32, #tpu.memory_space<vmem>>, vector<1x8x8x4xf32>
    %47 = vector.shape_cast %46 : vector<1x8x8x4xf32> to vector<8x8x4xf32>
    %48 = arith.cmpf ogt, %47, %45 : vector<8x8x4xf32>
    %c17_i32 = arith.constant 17 : i32
    %49 = vector.broadcast %c17_i32 : i32 to vector<8x8x4xi32>
    %50 = arith.select %48, %49, %44 : vector<8x8x4xi1>, vector<8x8x4xi32>
    %51 = arith.select %48, %47, %45 : vector<8x8x4xi1>, vector<8x8x4xf32>
    %c0_61 = arith.constant 0 : index
    %c1_62 = arith.constant 1 : index
    %c0_63 = arith.constant 0 : index
    %52 = vector.load %arg7[%c0_61, %c1_62, %c0_63] : memref<8x9x4xf32, #tpu.memory_space<vmem>>, vector<8x8x4xf32>
    %53 = arith.cmpf ogt, %52, %51 : vector<8x8x4xf32>
    %c18_i32 = arith.constant 18 : i32
    %54 = vector.broadcast %c18_i32 : i32 to vector<8x8x4xi32>
    %55 = arith.select %53, %54, %50 : vector<8x8x4xi1>, vector<8x8x4xi32>
    %56 = arith.select %53, %52, %51 : vector<8x8x4xi1>, vector<8x8x4xf32>
    %c1_64 = arith.constant 1 : index
    %c0_65 = arith.constant 0 : index
    %c0_66 = arith.constant 0 : index
    %57 = vector.load %arg9[%c1_64, %c0_65, %c0_66] : memref<9x9x4xf32, #tpu.memory_space<vmem>>, vector<8x8x4xf32>
    %58 = arith.cmpf ogt, %57, %56 : vector<8x8x4xf32>
    %c32_i32 = arith.constant 32 : i32
    %59 = vector.broadcast %c32_i32 : i32 to vector<8x8x4xi32>
    %60 = arith.select %58, %59, %55 : vector<8x8x4xi1>, vector<8x8x4xi32>
    %61 = arith.select %58, %57, %56 : vector<8x8x4xi1>, vector<8x8x4xf32>
    %c1_67 = arith.constant 1 : index
    %c0_68 = arith.constant 0 : index
    %c0_69 = arith.constant 0 : index
    %62 = vector.load %arg8[%c1_67, %c0_68, %c0_69] : memref<9x8x4xf32, #tpu.memory_space<vmem>>, vector<8x8x4xf32>
    %63 = arith.cmpf ogt, %62, %61 : vector<8x8x4xf32>
    %c33_i32 = arith.constant 33 : i32
    %64 = vector.broadcast %c33_i32 : i32 to vector<8x8x4xi32>
    %65 = arith.select %63, %64, %60 : vector<8x8x4xi1>, vector<8x8x4xi32>
    %66 = arith.select %63, %62, %61 : vector<8x8x4xi1>, vector<8x8x4xf32>
    %c1_70 = arith.constant 1 : index
    %c1_71 = arith.constant 1 : index
    %c0_72 = arith.constant 0 : index
    %67 = vector.load %arg9[%c1_70, %c1_71, %c0_72] : memref<9x9x4xf32, #tpu.memory_space<vmem>>, vector<8x8x4xf32>
    %68 = arith.cmpf ogt, %67, %66 : vector<8x8x4xf32>
    %c34_i32 = arith.constant 34 : i32
    %69 = vector.broadcast %c34_i32 : i32 to vector<8x8x4xi32>
    %70 = arith.select %68, %69, %65 : vector<8x8x4xi1>, vector<8x8x4xi32>
    %71 = arith.select %68, %67, %66 : vector<8x8x4xi1>, vector<8x8x4xf32>
    %72 = tpu.iota {dimensions = array<i32: 0>} : vector<8x8x1xi32>
    %73 = tpu.iota {dimensions = array<i32: 1>} : vector<8x8x1xi32>
    %c32_i32_73 = arith.constant 32 : i32
    %74 = vector.broadcast %c32_i32_73 : i32 to vector<8x8x1xi32>
    %75 = arith.muli %72, %74 : vector<8x8x1xi32>
    %c2_i32_74 = arith.constant 2 : i32
    %76 = vector.broadcast %c2_i32_74 : i32 to vector<8x8x1xi32>
    %77 = arith.muli %73, %76 : vector<8x8x1xi32>
    %78 = arith.addi %75, %77 : vector<8x8x1xi32>
    %c256_i32 = arith.constant 256 : i32
    %79 = arith.muli %arg2, %c256_i32 : i32
    %c16_i32_75 = arith.constant 16 : i32
    %80 = arith.subi %79, %c16_i32_75 : i32
    %c1_i32_76 = arith.constant 1 : i32
    %81 = arith.subi %80, %c1_i32_76 : i32
    %82 = vector.broadcast %81 : i32 to vector<8x8x1xi32>
    %83 = arith.addi %78, %82 : vector<8x8x1xi32>
    %c0_77 = arith.constant 0 : index
    %c0_78 = arith.constant 0 : index
    %c0_79 = arith.constant 0 : index
    %c0_80 = arith.constant 0 : index
    %84 = vector.load %arg5[%c0_77, %c0_78, %c0_79, %c0_80] : memref<1x8x8x4xf32, #tpu.memory_space<vmem>>, vector<1x8x8x4xf32>
    %85 = vector.shape_cast %84 : vector<1x8x8x4xf32> to vector<8x8x4xf32>
    %86 = vector.shape_cast %71 : vector<8x8x4xf32> to vector<1x8x8x4xf32>
    tpu.vector_store %arg5[%c0_77, %c0_78, %c0_79, %c0_80], %86 {strides = array<i32>} : memref<1x8x8x4xf32, #tpu.memory_space<vmem>>, vector<1x8x8x4xf32>,
    %87 = vector.broadcast %83 : vector<8x8x1xi32> to vector<8x8x4xi32>
    %88 = arith.addi %87, %70 : vector<8x8x4xi32>
    %c0_81 = arith.constant 0 : index
    %c0_82 = arith.constant 0 : index
    %c0_83 = arith.constant 0 : index
    %c0_84 = arith.constant 0 : index
    %89 = vector.load %arg6[%c0_81, %c0_82, %c0_83, %c0_84] : memref<1x8x8x4xi32, #tpu.memory_space<vmem>>, vector<1x8x8x4xi32>
    %90 = vector.shape_cast %89 : vector<1x8x8x4xi32> to vector<8x8x4xi32>
    %91 = vector.shape_cast %88 : vector<8x8x4xi32> to vector<1x8x8x4xi32>
    tpu.vector_store %arg6[%c0_81, %c0_82, %c0_83, %c0_84], %91 {strides = array<i32>} : memref<1x8x8x4xi32, #tpu.memory_space<vmem>>, vector<1x8x8x4xi32>,
    return
  }
  func.func @transform_0(%arg0: i32, %arg1: i32, %arg2: i32) -> (i32, i32, i32, i32) {
    %c0_i32 = arith.constant 0 : i32
    %c0_i32_0 = arith.constant 0 : i32
    return %arg0, %arg2, %c0_i32, %arg1 : i32, i32, i32, i32
  }
  func.func @transform_1(%arg0: i32, %arg1: i32, %arg2: i32) -> (i32, i32, i32, i32) {
    %c16_i32 = arith.constant 16 : i32
    %0 = arith.muli %c16_i32, %arg2 : i32
    %c1_i32 = arith.constant 1 : i32
    %1 = arith.subi %0, %c1_i32 : i32
    %c0_i32 = arith.constant 0 : i32
    %2 = arith.maxsi %1, %c0_i32 : i32
    %c0_i32_0 = arith.constant 0 : i32
    %c0_i32_1 = arith.constant 0 : i32
    return %arg0, %2, %c0_i32_0, %arg1 : i32, i32, i32, i32
  }
  func.func @transform_2(%arg0: i32, %arg1: i32, %arg2: i32) -> (i32, i32, i32, i32) {
    %c0_i32 = arith.constant 0 : i32
    %c0_i32_0 = arith.constant 0 : i32
    return %arg0, %arg2, %c0_i32, %arg1 : i32, i32, i32, i32
  }
  func.func @transform_3(%arg0: i32, %arg1: i32, %arg2: i32) -> (i32, i32, i32, i32) {
    %c0_i32 = arith.constant 0 : i32
    %c0_i32_0 = arith.constant 0 : i32
    return %arg0, %arg2, %c0_i32, %arg1 : i32, i32, i32, i32
  }
}

</mosaic_0001>

<bundles_post_ra>
// kernel: tpu_custom_call.1
= control target key start
LH: loop header
LB: loop body
LE: loop exit
PB: predicated region body
PF: predicated region fallthrough
CT: control target
= control target key end

     0   :  { %s1108_s12 = smov 0   ;;  %s1110_s13 = smov 0   ;;  %s2074_s0 = inlined_call_operand.vmem [shape: f32[2,16,16,4], index: 0, kind: input, shape index: {}]   ;;  %s2075_s1 = inlined_call_operand.vmem [shape: f32[2,16,16,4], index: 1, kind: input, shape index: {}]   ;;  %s2076_s2 = inlined_call_operand.vmem [shape: f32[2,8,8,4], index: 2, kind: output, shape index: {0}]   ;;  %s2077_s3 = inlined_call_operand.vmem [shape: s32[2,8,8,4], index: 3, kind: output, shape index: {1}]  }
   0x1   :  { %s1112_s14 = smov 0  }
   0x2 LB: > { %s33_s1 = sadd.s32 1, %s1080_s13  ;;  %p989_p0 = scmp.ge.s32.totalorder %s1084_s14, 1  ;;  %s1084_s14 = sphi %s1112_s14, %s14_s14   ;;  %s1080_s13 = sphi %s1110_s13, %s2235_s13   ;;  %s1076_s12 = sphi %s1108_s12, %s2234_s12  }
   0x3   : > { %p35_p1 = scmp.ge.s32.totalorder %s33_s1, 2  ;;  %p217_p2 = scmp.lt.s32.totalorder %s1084_s14, 3 }
   0x5   : > { %s2237_s1 = smov (%p35_p1, %s33_s1), 0  ;;  %p218_p3 = pnand %p989_p0, %p217_p2 }
   0x7   : > { %221 = sbr.rel (%p218_p3) target bundleno = 123 (0x7b), region = 28 }
   0xc   : > { %vm344_vm0 = vcmask 24576   ;;  %v1086_v0 = vmov -inf   ;;  %p285_p4 = scmp.lt.s32.totalorder %s1076_s12, 1  ;;  %vm369_vm1 = vcmask 31744   ;;  %v735_v5 = vlaneseq }
   0xd   : > { %403 = vst.msk [vmem:[#allocation4] sm:$0x1] %vm344_vm0, %v1086_v0  ;;  %v2093_v26 = vmov 0  }
   0xe   : > { %345 = vst.msk [vmem:[#allocation2] sm:$0x1] %vm344_vm0, %v1086_v0  ;;  %s2239_s12 = smov (!%p285_p4, %s1076_s12), 1  ;;  %v736_v11 = vshrl.u32 %v735_v5, 7 }
   0xf   : > { %346 = vst.msk [vmem:[#allocation2 + $0x10] sm:$0x1] %vm344_vm0, %v1086_v0  ;;  %s1032_s15 = sshll.u32 %s2239_s12, 8  ;;  %s1034_s19 = sshll.u32 %s2239_s12, 6 }
  0x10   : > { %347 = vst.msk [vmem:[#allocation2 + $0x20] sm:$0x1] %vm344_vm0, %v1086_v0  ;;  %s1146_s18 = scalar_lea.vmem %s2074_s0, %s1032_s15  ;;  %v1178_v22 = vmul.u32 2, %v736_v11  ;;  %s1326_s22 = scalar_lea.vmem %s2076_s2, %s1034_s19 }
  0x11   : > { %348 = vst.msk [vmem:[#allocation2 + $0x30] sm:$0x1] %vm344_vm0, %v1086_v0  ;;  %v998_v1 = vld [vmem:[%s1146_s18 + $0x1] ss:$2 sm:$0xff]  ;;  %v1014_v2 = vld [vmem:[%s1146_s18 + $0x11] ss:$2 sm:$0xff]  ;;  %s1365_s25 = scalar_lea.vmem %s2077_s3, %s1034_s19 }
  0x12   : > { %349 = vst.msk [vmem:[#allocation2 + $0x40] sm:$0x1] %vm344_vm0, %v1086_v0  ;;  %v1015_v3 = vld [vmem:[%s1146_s18 + $0x31] ss:$2 sm:$0xff]  ;;  %v1006_v10 = vld [vmem:[%s1146_s18 + $0x10] ss:$2 sm:$0xff] }
  0x13   : > { %350 = vst.msk [vmem:[#allocation2 + $0x50] sm:$0x1] %vm344_vm0, %v1086_v0  ;;  %v1016_v4 = vld [vmem:[%s1146_s18 + $0x51] ss:$2 sm:$0xff]  ;;  %v1007_v12 = vld [vmem:[%s1146_s18 + $0x30] ss:$2 sm:$0xff] }
  0x14   : > { %351 = vst.msk [vmem:[#allocation2 + $0x60] sm:$0x1] %vm344_vm0, %v1086_v0  ;;  %v1017_v6 = vld [vmem:[%s1146_s18 + $0x71] ss:$2 sm:$0xff]  ;;  %v1008_v13 = vld [vmem:[%s1146_s18 + $0x50] ss:$2 sm:$0xff] }
  0x15   : > { %352 = vst.msk [vmem:[#allocation2 + $0x70] sm:$0x1] %vm344_vm0, %v1086_v0  ;;  %v1018_v7 = vld [vmem:[%s1146_s18 + $0x91] ss:$2 sm:$0xff]  ;;  %v1009_v15 = vld [vmem:[%s1146_s18 + $0x70] ss:$2 sm:$0xff] }
  0x16   : > { %404 = vst.msk [vmem:[#allocation4 + $0x10] sm:$0x1] %vm344_vm0, %v1086_v0  ;;  %v1019_v8 = vld [vmem:[%s1146_s18 + $0xb1] ss:$2 sm:$0xff]  ;;  %v1010_v17 = vld [vmem:[%s1146_s18 + $0x90] ss:$2 sm:$0xff] }
  0x17   : > { %405 = vst.msk [vmem:[#allocation4 + $0x20] sm:$0x1] %vm344_vm0, %v1086_v0  ;;  %v1020_v9 = vld [vmem:[%s1146_s18 + $0xd1] ss:$2 sm:$0xff]  ;;  %v1011_v20 = vld [vmem:[%s1146_s18 + $0xb0] ss:$2 sm:$0xff] }
  0x18   : > { %406 = vst.msk [vmem:[#allocation4 + $0x30] sm:$0x1] %vm344_vm0, %v1086_v0  ;;  %v1012_v23 = vld [vmem:[%s1146_s18 + $0xd0] ss:$2 sm:$0xff]  ;;  %v999_v29 = vld [vmem:[%s1146_s18 + $0x21] ss:$2 sm:$0xff] }
  0x19   : > { %407 = vst.msk [vmem:[#allocation4 + $0x40] sm:$0x1] %vm344_vm0, %v1086_v0  ;;  %v1000_v31 = vld [vmem:[%s1146_s18 + $0x41] ss:$2 sm:$0xff]  ;;  %v568_v33 = vld [vmem:[%s1146_s18] ss:$2 sm:$0xff] }
  0x1a   : > { %408 = vst.msk [vmem:[#allocation4 + $0x50] sm:$0x1] %vm344_vm0, %v1086_v0  ;;  %v1001_v36 = vld [vmem:[%s1146_s18 + $0x61] ss:$2 sm:$0xff]  ;;  %v1200_v37 = vadd.s32 4294967279, %v1178_v22 }
  0x1b   : > { %409 = vst.msk [vmem:[#allocation4 + $0x60] sm:$0x1] %vm344_vm0, %v1086_v0  ;;  %v1002_v40 = vld [vmem:[%s1146_s18 + $0x81] ss:$2 sm:$0xff] }
  0x1c   : > { %410 = vst.msk [vmem:[#allocation4 + $0x70] sm:$0x1] %vm344_vm0, %v1086_v0  ;;  %v1003_v53 = vld [vmem:[%s1146_s18 + $0xa1] ss:$2 sm:$0xff] }
  0x1d   : > { %411 = vst.msk [vmem:[#allocation4 + $0x80] sm:$0x1] %vm344_vm0, %v1086_v0  ;;  %v1004_v57 = vld [vmem:[%s1146_s18 + $0xc1] ss:$2 sm:$0xff] }
  0x1e   : > { %447 = vst.msk [vmem:[#allocation4 + $0x1] sm:$0xff] %vm369_vm1, %v1086_v0  ;;  %v1005_v63 = vld [vmem:[%s1146_s18 + $0xe1] ss:$2 sm:$0xff] }
  0x1f   : > { %445 = vst.msk [vmem:[#allocation3] sm:$0xff] %vm369_vm1, %v1086_v0 }
  0x20   : > { %370 = vst.msk [vmem:[#allocation2 + $0x1] sm:$0xff] %vm369_vm1, %v998_v1 }
  0x21   : > { %429 = vst.msk [vmem:[#allocation4 + $0x11] sm:$0xff] %vm369_vm1, %v1014_v2 }
  0x22   : > { %430 = vst.msk [vmem:[#allocation4 + $0x21] sm:$0xff] %vm369_vm1, %v1015_v3  ;;  %v1021_v3 = vld [vmem:[%s1146_s18 + $0xf1] ss:$2 sm:$0xff] }
  0x23   : > { %431 = vst.msk [vmem:[#allocation4 + $0x31] sm:$0xff] %vm369_vm1, %v1016_v4 }
  0x24   : > { %432 = vst.msk [vmem:[#allocation4 + $0x41] sm:$0xff] %vm369_vm1, %v1017_v6 }
  0x25   : > { %433 = vst.msk [vmem:[#allocation4 + $0x51] sm:$0xff] %vm369_vm1, %v1018_v7  ;;  %v448_v14 = vld [vmem:[#allocation4] sm:$0xff] }
  0x26   : > { %434 = vst.msk [vmem:[#allocation4 + $0x61] sm:$0xff] %vm369_vm1, %v1019_v8  ;;  %vm456_vm2 = vcmp.gt.f32.partialorder %v448_v14, -inf  ;;  %v472_v16 = vld [vmem:[#allocation3] sm:$0xff]  ;;  %v504_v19 = vld [vmem:[#allocation4 + $0x1] sm:$0xff] }
  0x27   : > { %435 = vst.msk [vmem:[#allocation4 + $0x71] sm:$0xff] %vm369_vm1, %v1020_v9  ;;  %v464_v18 = vsel %vm456_vm2, %v448_v14, -inf  ;;  %v536_v25 = vld [vmem:[#allocation2] sm:$0xff]  ;;  %v1013_v8 = vld [vmem:[%s1146_s18 + $0xf0] ss:$2 sm:$0xff] }
  0x28   : > { %395 = vst.msk [vmem:[#allocation3 + $0x8] sm:$0xff] %vm369_vm1, %v1006_v10  ;;  %vm480_vm3 = vcmp.gt.f32.partialorder %v472_v16, %v464_v18  ;;  %v1176_v21 = vld [vmem:[#allocation4 + $0x10] sm:$0xff]  ;;  %v607_v42 = vld [vmem:[#allocation2 + $0x1] sm:$0xff] }
  0x29   : > { %396 = vst.msk [vmem:[#allocation3 + $0x10] sm:$0xff] %vm369_vm1, %v1007_v12  ;;  %v496_v24 = vsel %vm480_vm3, %v472_v16, %v464_v18  ;;  %v488_v27 = vsel %vm480_vm3, 1, %v2093_v26  ;;  %vm457_vm4 = vcmp.gt.f32.partialorder %v1176_v21, -inf  ;;  %v1184_v28 = vld [vmem:[#allocation4 + $0x20] sm:$0xff]  ;;  %v1253_v59 = vld [vmem:[#allocation4 + $0x11] sm:$0xff] }
  0x2a   : > { %397 = vst.msk [vmem:[#allocation3 + $0x18] sm:$0xff] %vm369_vm1, %v1008_v13  ;;  %vm512_vm5 = vcmp.gt.f32.partialorder %v504_v19, %v496_v24  ;;  %vm458_vm6 = vcmp.gt.f32.partialorder %v1184_v28, -inf  ;;  %v1189_v30 = vld [vmem:[#allocation4 + $0x30] sm:$0xff]  ;;  %v1205_v38 = vsel %vm457_vm4, %v1176_v21, -inf  ;;  %v1272_v0 = vld [vmem:[#allocation4 + $0x21] sm:$0xff] }
  0x2b   : > { %398 = vst.msk [vmem:[#allocation3 + $0x20] sm:$0xff] %vm369_vm1, %v1009_v15  ;;  %v528_v32 = vsel %vm512_vm5, %v504_v19, %v496_v24  ;;  %v520_v34 = vsel %vm512_vm5, 2, %v488_v27  ;;  %vm459_vm7 = vcmp.gt.f32.partialorder %v1189_v30, -inf  ;;  %v1195_v35 = vld [vmem:[#allocation4 + $0x40] sm:$0xff]  ;;  %v1215_v44 = vsel %vm458_vm6, %v1184_v28, -inf  ;;  %v1309_v10 = vld [vmem:[#allocation4 + $0x31] sm:$0xff] }
  0x2c   : > { %2144 = vst [vmem:[#allocation5_spill] sm:$0xff] %v1195_v35  ;;  %vm544_vm8 = vcmp.gt.f32.partialorder %v536_v25, %v528_v32  ;;  %vm460_vm9 = vcmp.gt.f32.partialorder %v1195_v35, -inf  ;;  %v1208_v39 = vld [vmem:[#allocation4 + $0x50] sm:$0xff]  ;;  %v1224_v46 = vsel %vm459_vm7, %v1189_v30, -inf  ;;  %v1331_v14 = vld [vmem:[#allocation4 + $0x41] sm:$0xff] }
  0x2d   : > { %399 = vst.msk [vmem:[#allocation3 + $0x28] sm:$0xff] %vm369_vm1, %v1010_v17  ;;  %v560_v41 = vsel %vm544_vm8, %v536_v25, %v528_v32  ;;  %v552_v43 = vsel %vm544_vm8, 16, %v520_v34  ;;  %vm461_vm10 = vcmp.gt.f32.partialorder %v1208_v39, -inf  ;;  %v1218_v45 = vld [vmem:[#allocation4 + $0x60] sm:$0xff]  ;;  %v1227_v47 = vsel %vm460_vm9, %v1195_v35, -inf  ;;  %v1398_v32 = vld [vmem:[#allocation4 + $0x51] sm:$0xff] }
  0x2e   : > { %2145 = vst [vmem:[#allocation6_spill] sm:$0xff] %v1208_v39  ;;  %vm583_vm11 = vcmp.gt.f32.partialorder %v568_v33, %v560_v41  ;;  %vm462_vm12 = vcmp.gt.f32.partialorder %v1218_v45, -inf  ;;  %v1230_v48 = vld [vmem:[#allocation4 + $0x70] sm:$0xff]  ;;  %v1236_v52 = vsel %vm461_vm10, %v1208_v39, -inf  ;;  %v1345_v17 = vld [vmem:[%s1146_s18 + $0x20] ss:$2 sm:$0xff] }
  0x2f   : > { %400 = vst.msk [vmem:[#allocation3 + $0x30] sm:$0xff] %vm369_vm1, %v1011_v20  ;;  %v599_v49 = vsel %vm583_vm11, %v568_v33, %v560_v41  ;;  %v1233_v50 = vld [vmem:[#allocation3 + $0x8] sm:$0xff]  ;;  %v591_v51 = vsel %vm583_vm11, 17, %v552_v43  ;;  %vm463_vm13 = vcmp.gt.f32.partialorder %v1230_v48, -inf  ;;  %v1246_v55 = vsel %vm462_vm12, %v1218_v45, -inf }
  0x30   : > { %401 = vst.msk [vmem:[#allocation3 + $0x38] sm:$0xff] %vm369_vm1, %v1012_v23  ;;  %vm615_vm14 = vcmp.gt.f32.partialorder %v607_v42, %v599_v49  ;;  %vm481_vm15 = vcmp.gt.f32.partialorder %v1233_v50, %v1205_v38  ;;  %v1243_v54 = vld [vmem:[#allocation3 + $0x10] sm:$0xff]  ;;  %v1249_v56 = vsel %vm463_vm13, %v1230_v48, -inf  ;;  %v1372_v23 = vld [vmem:[%s1146_s18 + $0x40] ss:$2 sm:$0xff] }
  0x31   : > { %371 = vst.msk [vmem:[#allocation2 + $0x11] sm:$0xff] %vm369_vm1, %v999_v29  ;;  %v631_v58 = vsel %vm615_vm14, %v607_v42, %v599_v49  ;;  %v623_v60 = vsel %vm615_vm14, 18, %v591_v51  ;;  %v1260_v61 = vsel %vm481_vm15, %v1233_v50, %v1205_v38  ;;  %vm482_vm0 = vcmp.gt.f32.partialorder %v1243_v54, %v1215_v44  ;;  %v1264_v62 = vld [vmem:[#allocation3 + $0x18] sm:$0xff] }
  0x32   : > { %2146 = vst [vmem:[#allocation7_spill] sm:$0xff] %v1236_v52  ;;  %vm647_vm2 = vcmp.gt.f32.partialorder %v1176_v21, %v631_v58  ;;  %vm513_vm3 = vcmp.gt.f32.partialorder %v1253_v59, %v1260_v61  ;;  %v1279_v1 = vsel %vm482_vm0, %v1243_v54, %v1215_v44  ;;  %vm2084_vm4 = vcmp.gt.f32.partialorder %v1264_v62, %v1224_v46  ;;  %v1283_v2 = vld [vmem:[#allocation3 + $0x20] sm:$0xff] }
  0x33   : > { %372 = vst.msk [vmem:[#allocation2 + $0x21] sm:$0xff] %vm369_vm1, %v1000_v31  ;;  %v663_v4 = vsel %vm647_vm2, %v1176_v21, %v631_v58  ;;  %v655_v5 = vsel %vm647_vm2, 32, %v623_v60  ;;  %v1293_v6 = vsel %vm513_vm3, %v1253_v59, %v1260_v61  ;;  %vm514_vm5 = vcmp.gt.f32.partialorder %v1272_v0, %v1279_v1  ;;  %v1396_v31 = vld [vmem:[%s1146_s18 + $0x60] ss:$2 sm:$0xff] }
  0x34   : > { %2147 = vst [vmem:[#allocation8_spill] sm:$0xff] %v1246_v55  ;;  %v1297_v7 = vld [vmem:[#allocation3 + $0x28] sm:$0xff]  ;;  %vm679_vm6 = vcmp.gt.f32.partialorder %v1233_v50, %v663_v4  ;;  %v1307_v9 = vsel %vm514_vm5, %v1272_v0, %v1279_v1  ;;  %v1316_v11 = vsel %vm2084_vm4, %v1264_v62, %v1224_v46  ;;  %vm2080_vm7 = vcmp.gt.f32.partialorder %v1283_v2, %v1227_v47 }
  0x35   : > { %2148 = vst [vmem:[#allocation9_spill] sm:$0xff] %v1249_v56  ;;  %v695_v12 = vsel %vm679_vm6, %v1233_v50, %v663_v4  ;;  %v687_v13 = vsel %vm679_vm6, 33, %v655_v5  ;;  %vm2083_vm8 = vcmp.gt.f32.partialorder %v1309_v10, %v1316_v11  ;;  %v1338_v15 = vsel %vm2080_vm7, %v1283_v2, %v1227_v47 }
  0x36   : > { %373 = vst.msk [vmem:[#allocation2 + $0x31] sm:$0xff] %vm369_vm1, %v1001_v36  ;;  %vm711_vm9 = vcmp.gt.f32.partialorder %v1253_v59, %v695_v12  ;;  %v1352_v18 = vsel %vm2083_vm8, %v1309_v10, %v1316_v11  ;;  %vm2079_vm10 = vcmp.gt.f32.partialorder %v1331_v14, %v1338_v15  ;;  %vm2078_vm11 = vcmp.gt.f32.partialorder %v1297_v7, %v1236_v52 }
  0x37   : > { %374 = vst.msk [vmem:[#allocation2 + $0x41] sm:$0xff] %vm369_vm1, %v1002_v40  ;;  %v727_v19 = vsel %vm711_vm9, %v1253_v59, %v695_v12  ;;  %v719_v20 = vsel %vm711_vm9, 34, %v687_v13  ;;  %v1379_v24 = vsel %vm2079_vm10, %v1331_v14, %v1338_v15  ;;  %v1405_v33 = vsel %vm2078_vm11, %v1297_v7, %v1236_v52 }
  0x38   : > { %375 = vst.msk [vmem:[#allocation2 + $0x51] sm:$0xff] %vm369_vm1, %v1003_v53  ;;  %v1342_v16 = vld [vmem:[#allocation2 + $0x10] sm:$0xff]  ;;  %v764_v25 = vadd.s32 %v1200_v37, %v719_v20  ;;  %v1421_v37 = vld [vmem:[%s1146_s18 + $0x80] ss:$2 sm:$0xff]  ;;  %vm2108_vm6 = vcmp.gt.f32.partialorder %v1398_v32, %v1405_v33 }
  0x39   : > { %2149 = vst [vmem:[#allocation10_spill] sm:$0xff] %v1297_v7  ;;  %vm545_vm12 = vcmp.gt.f32.partialorder %v1342_v16, %v1293_v6  ;;  %v1434_v41 = vld [vmem:[#allocation2 + $0x11] sm:$0xff] }
  0x3a   : > { %376 = vst.msk [vmem:[#allocation2 + $0x61] sm:$0xff] %vm369_vm1, %v1004_v57  ;;  %v1369_v21 = vld [vmem:[#allocation2 + $0x20] sm:$0xff]  ;;  %v1389_v27 = vsel %vm545_vm12, %v1342_v16, %v1293_v6 }
  0x3b   : > { %377 = vst.msk [vmem:[#allocation2 + $0x71] sm:$0xff] %vm369_vm1, %v1005_v63  ;;  %vm2092_vm13 = vcmp.gt.f32.partialorder %v1369_v21, %v1307_v9  ;;  %vm584_vm14 = vcmp.gt.f32.partialorder %v1345_v17, %v1389_v27  ;;  %v1456_v49 = vld [vmem:[#allocation2 + $0x21] sm:$0xff] }
  0x3c   : > { %436 = vst.msk [vmem:[#allocation4 + $0x81] sm:$0xff] %vm369_vm1, %v1021_v3  ;;  %v1414_v34 = vsel %vm2092_vm13, %v1369_v21, %v1307_v9  ;;  %v1432_v40 = vsel %vm584_vm14, %v1345_v17, %v1389_v27 }
  0x3d   : > { %402 = vst.msk [vmem:[#allocation3 + $0x40] sm:$0xff] %vm369_vm1, %v1013_v8  ;;  %v1393_v29 = vld [vmem:[#allocation2 + $0x30] sm:$0xff]  ;;  %vm2088_vm9 = vcmp.gt.f32.partialorder %v1372_v23, %v1414_v34  ;;  %vm616_vm10 = vcmp.gt.f32.partialorder %v1434_v41, %v1432_v40 }
  0x3e   : > { %756 = vst.msk [vmem:[%s1326_s22] sm:$0xff] %vm369_vm1, %v727_v19  ;;  %vm2081_vm2 = vcmp.gt.f32.partialorder %v1393_v29, %v1352_v18  ;;  %v1418_v36 = vld [vmem:[#allocation2 + $0x40] sm:$0xff]  ;;  %v1454_v43 = vsel %vm2088_vm9, %v1372_v23, %v1414_v34  ;;  %v1472_v53 = vsel %vm616_vm10, %v1434_v41, %v1432_v40  ;;  %v1483_v58 = vld [vmem:[#allocation2 + $0x31] sm:$0xff] }
  0x3f   : > { %2150 = vst [vmem:[#allocation11_spill] sm:$0xff] %v1398_v32  ;;  %v1443_v42 = vsel %vm2081_vm2, %v1393_v29, %v1352_v18  ;;  %vm2082_vm11 = vcmp.gt.f32.partialorder %v1418_v36, %v1379_v24  ;;  %vm2087_vm2 = vcmp.gt.f32.partialorder %v1456_v49, %v1454_v43  ;;  %vm648_vm8 = vcmp.gt.f32.partialorder %v1184_v28, %v1472_v53  ;;  %v1505_v3 = vld [vmem:[#allocation2 + $0x41] sm:$0xff]  ;;  %v1579_v26 = vld [vmem:[#allocation2 + $0x50] sm:$0xff] }
  0x40   : > { %2151 = vst [vmem:[#allocation12_spill] sm:$0xff] %v1405_v33  ;;  %vm2085_vm7 = vcmp.gt.f32.partialorder %v1396_v31, %v1443_v42  ;;  %v1465_v51 = vsel %vm2082_vm11, %v1418_v36, %v1379_v24  ;;  %v1494_v60 = vsel %vm2087_vm2, %v1456_v49, %v1454_v43  ;;  %v1512_v4 = vsel %vm648_vm8, %v1184_v28, %v1472_v53 }
  0x41   : > { %772 = vst.msk [vmem:[%s1365_s25] sm:$0xff] %vm369_vm1, %v764_v25  ;;  %v1481_v57 = vsel %vm2085_vm7, %v1396_v31, %v1443_v42  ;;  %vm2086_vm11 = vcmp.gt.f32.partialorder %v1421_v37, %v1465_v51  ;;  %vm2091_vm7 = vcmp.gt.f32.partialorder %v1189_v30, %v1494_v60  ;;  %vm680_vm2 = vcmp.gt.f32.partialorder %v1243_v54, %v1512_v4 }
  0x42   : > { %2152 = vst [vmem:[#allocation13_spill] sm:$0xff] %v1465_v51  ;;  %vm2089_vm4 = vcmp.gt.f32.partialorder %v1483_v58, %v1481_v57  ;;  %v1503_v63 = vsel %vm2086_vm11, %v1421_v37, %v1465_v51  ;;  %v1532_v8 = vsel %vm2091_vm7, %v1189_v30, %v1494_v60  ;;  %v1548_v13 = vsel %vm680_vm2, %v1243_v54, %v1512_v4  ;;  %v1705_v51 = vld [vmem:[%s1146_s18 + $0xc0] ss:$2 sm:$0xff] }
  0x43   : > { %2153 = vst [vmem:[#allocation14_spill] sm:$0xff] %v1503_v63  ;;  %v1521_v5 = vsel %vm2089_vm4, %v1483_v58, %v1481_v57  ;;  %vm2090_vm11 = vcmp.gt.f32.partialorder %v1505_v3, %v1503_v63  ;;  %vm2102_vm4 = vcmp.gt.f32.partialorder %v1264_v62, %v1532_v8  ;;  %vm712_vm7 = vcmp.gt.f32.partialorder %v1272_v0, %v1548_v13  ;;  %v1888_v1 = vld [vmem:[#allocation4 + $0x81] sm:$0xff] }
  0x44   : > { %2154 = vst [vmem:[#allocation15_spill] sm:$0xff] %v1505_v3  ;;  %vm2097_vm9 = vcmp.gt.f32.partialorder %v1195_v35, %v1521_v5  ;;  %v1541_v12 = vsel %vm2090_vm11, %v1505_v3, %v1503_v63  ;;  %v1568_v20 = vsel %vm2102_vm4, %v1264_v62, %v1532_v8  ;;  %v1581_v63 = vld [vmem:[#allocation3 + $0x30] sm:$0xff]  ;;  %v728_v3 = vsel %vm712_vm7, %v1272_v0, %v1548_v13 }
  0x45   : > { %2155 = vst [vmem:[#allocation16_spill] sm:$0xff] %v1521_v5  ;;  %v1557_v19 = vsel %vm2097_vm9, %v1195_v35, %v1521_v5  ;;  %vm2099_vm11 = vcmp.gt.f32.partialorder %v1208_v39, %v1541_v12  ;;  %vm713_vm9 = vcmp.gt.f32.partialorder %v1309_v10, %v1568_v20  ;;  %v1625_v35 = vld [vmem:[%s1146_s18 + $0xa0] ss:$2 sm:$0xff] }
  0x46   : > { %2156 = vst [vmem:[#allocation17_spill] sm:$0xff] %v1541_v12  ;;  %vm2107_vm13 = vcmp.gt.f32.partialorder %v1283_v2, %v1557_v19  ;;  %v1577_v25 = vsel %vm2099_vm11, %v1208_v39, %v1541_v12  ;;  %v1599_v39 = vld [vmem:[#allocation3 + $0x38] sm:$0xff]  ;;  %v729_v5 = vsel %vm713_vm9, %v1309_v10, %v1568_v20 }
  0x47   : > { %2157 = vst [vmem:[#allocation18_spill] sm:$0xff] %v1557_v19  ;;  %v1595_v12 = vsel %vm2107_vm13, %v1283_v2, %v1557_v19  ;;  %vm2106_vm11 = vcmp.gt.f32.partialorder %v1297_v7, %v1577_v25 }
  0x48   : > { %2158 = vst [vmem:[#allocation19_spill] sm:$0xff] %v1577_v25  ;;  %vm2113_vm4 = vcmp.gt.f32.partialorder %v1331_v14, %v1595_v12  ;;  %v1615_v19 = vsel %vm2106_vm11, %v1297_v7, %v1577_v25  ;;  %v1695_v7 = vld [vmem:[#allocation2 + $0x51] sm:$0xff] }
  0x49   : > { %2159 = vst [vmem:[#allocation20_spill] sm:$0xff] %v1579_v26  ;;  %v730_v52 = vsel %vm2113_vm4, %v1331_v14, %v1595_v12  ;;  %vm2112_vm11 = vcmp.gt.f32.partialorder %v1398_v32, %v1615_v19 }
  0x4a   : > { %2160 = vst [vmem:[#allocation21_spill] sm:$0xff] %v1595_v12  ;;  %v1654_v12 = vld [vmem:[#allocation4 + $0x61] sm:$0xff] }
  0x4b   : > { %757 = vst.msk [vmem:[%s1326_s22 + $0x8] sm:$0xff] %vm369_vm1, %v728_v3  ;;  %v1622_v3 = vsel %vm2108_vm6, %v1398_v32, %v1405_v33  ;;  %vm486_vm6 = vcmp.gt.f32.partialorder %v1581_v63, %v1246_v55  ;;  %v1663_v33 = vld [vmem:[#allocation2 + $0x60] sm:$0xff] }
  0x4c   : > { %2161 = vst [vmem:[#allocation22_spill] sm:$0xff] %v1615_v19  ;;  %vm2114_vm13 = vcmp.gt.f32.partialorder %v1579_v26, %v1622_v3 }
  0x4d   : > { %2162 = vst [vmem:[#allocation23_spill] sm:$0xff] %v1622_v3  ;;  %v1652_v25 = vsel %vm2114_vm13, %v1579_v26, %v1622_v3  ;;  %v1682_v26 = vld [vmem:[#allocation2 + $0x70] sm:$0xff] }
  0x4e   : > { %758 = vst.msk [vmem:[%s1326_s22 + $0x10] sm:$0xff] %vm369_vm1, %v729_v5  ;;  %v731_v5 = vsel %vm2112_vm11, %v1398_v32, %v1615_v19  ;;  %vm2125_vm11 = vcmp.gt.f32.partialorder %v1599_v39, %v1249_v56  ;;  %vm2126_vm4 = vcmp.gt.f32.partialorder %v1625_v35, %v1652_v25  ;;  %v1673_v19 = vld [vmem:[#allocation4 + $0x71] sm:$0xff] }
  0x4f   : > { %759 = vst.msk [vmem:[%s1326_s22 + $0x18] sm:$0xff] %vm369_vm1, %v730_v52  ;;  %v1661_v52 = vsel %vm486_vm6, %v1581_v63, %v1246_v55  ;;  %v1680_v3 = vsel %vm2125_vm11, %v1599_v39, %v1249_v56  ;;  %v2166_v55 = vmov 0   ;;  %v1693_v32 = vsel %vm2126_vm4, %v1625_v35, %v1652_v25 }
  0x50   : > { %2163 = vst [vmem:[#allocation24_spill] sm:$0xff] %v1661_v52  ;;  %vm518_vm13 = vcmp.gt.f32.partialorder %v1654_v12, %v1661_v52  ;;  %vm620_vm11 = vcmp.gt.f32.partialorder %v1695_v7, %v1693_v32 }
  0x51   : > { %760 = vst.msk [vmem:[%s1326_s22 + $0x20] sm:$0xff] %vm369_vm1, %v731_v5  ;;  %v489_v5 = vsel %vm481_vm15, 1, %v2166_v55  ;;  %v1702_v56 = vsel %vm518_vm13, %v1654_v12, %v1661_v52  ;;  %vm2128_vm15 = vcmp.gt.f32.partialorder %v1673_v19, %v1680_v3  ;;  %v1724_v52 = vld [vmem:[%s1146_s18 + $0xe0] ss:$2 sm:$0xff]  ;;  %v1734_v61 = vsel %vm620_vm11, %v1695_v7, %v1693_v32 }
  0x52   : > { %2164 = vst [vmem:[#allocation25_spill] sm:$0xff] %v1680_v3  ;;  %v521_v38 = vsel %vm513_vm3, 2, %v489_v5  ;;  %vm550_vm4 = vcmp.gt.f32.partialorder %v1663_v33, %v1702_v56  ;;  %v1721_v50 = vsel %vm2128_vm15, %v1673_v19, %v1680_v3 }
  0x53   : > { %2165 = vst [vmem:[#allocation26_spill] sm:$0xff] %v1682_v26  ;;  %v553_v59 = vsel %vm545_vm12, 16, %v521_v38  ;;  %v1741_v5 = vsel %vm550_vm4, %v1663_v33, %v1702_v56  ;;  %vm2129_vm3 = vcmp.gt.f32.partialorder %v1682_v26, %v1721_v50  ;;  %vm652_vm12 = vcmp.gt.f32.partialorder %v1218_v45, %v1734_v61 }
  0x54   : > { %2167 = vst [vmem:[#allocation27_spill] sm:$0xff] %v1721_v50  ;;  %v592_v6 = vsel %vm584_vm14, 17, %v553_v59  ;;  %vm589_vm15 = vcmp.gt.f32.partialorder %v1705_v51, %v1741_v5  ;;  %v1757_v16 = vsel %vm2129_vm3, %v1682_v26, %v1721_v50  ;;  %v1767_v17 = vsel %vm652_vm12, %v1218_v45, %v1734_v61  ;;  %v1776_v59 = vld [vmem:[#allocation2 + $0x61] sm:$0xff]  ;;  %v2216_v45 = vld [vmem:[#allocation9_spill] sm:$0xff] }
  0x55   : > { %2168 = vst [vmem:[#allocation28_spill] sm:$0xff] %v1724_v52  ;;  %v624_v38 = vsel %vm616_vm10, 18, %v592_v6  ;;  %v1774_v27 = vsel %vm589_vm15, %v1705_v51, %v1741_v5  ;;  %vm2131_vm14 = vcmp.gt.f32.partialorder %v1724_v52, %v1757_v16  ;;  %vm684_vm10 = vcmp.gt.f32.partialorder %v1581_v63, %v1767_v17  ;;  %v1794_v6 = vld [vmem:[#allocation2 + $0x71] sm:$0xff]  ;;  %v1796_v50 = vld [vmem:[#allocation4 + $0x80] sm:$0xff] }
  0x56   : > { %2169 = vst [vmem:[#allocation29_spill] sm:$0xff] %v1757_v16  ;;  %v656_v40 = vsel %vm648_vm8, 32, %v624_v38  ;;  %vm621_vm3 = vcmp.gt.f32.partialorder %v1776_v59, %v1774_v27  ;;  %v1792_v41 = vsel %vm2131_vm14, %v1724_v52, %v1757_v16  ;;  %v1806_v53 = vsel %vm684_vm10, %v1581_v63, %v1767_v17  ;;  %v1831_v16 = vld [vmem:[#allocation3 + $0x40] sm:$0xff] }
  0x57   : > { %2170 = vst [vmem:[#allocation30_spill] sm:$0xff] %v1792_v41  ;;  %v688_v28 = vsel %vm680_vm2, 33, %v656_v40  ;;  %v1813_v38 = vsel %vm621_vm3, %v1776_v59, %v1774_v27  ;;  %vm2135_vm8 = vcmp.gt.f32.partialorder %v1794_v6, %v1792_v41  ;;  %vm716_vm2 = vcmp.gt.f32.partialorder %v1654_v12, %v1806_v53 }
  0x58   : > { %2171 = vst [vmem:[#allocation31_spill] sm:$0xff] %v1794_v6  ;;  %v720_v4 = vsel %vm712_vm7, 34, %v688_v28  ;;  %vm653_vm14 = vcmp.gt.f32.partialorder %v1230_v48, %v1813_v38  ;;  %v1829_v40 = vsel %vm2135_vm8, %v1794_v6, %v1792_v41  ;;  %v738_v52 = vadd.s32 32, %v1178_v22 }
  0x59   : > { %v732_v13 = vsel %vm716_vm2, %v1654_v12, %v1806_v53  ;;  %v1844_v28 = vsel %vm653_vm14, %v1230_v48, %v1813_v38  ;;  %vm2139_vm7 = vcmp.gt.f32.partialorder %v1796_v50, %v1829_v40  ;;  %v490_v41 = vsel %vm482_vm0, 1, %v2166_v55  ;;  %v2218_v5 = vld [vmem:[#allocation25_spill] sm:$0xff] }
  0x5a   : > { %761 = vst.msk [vmem:[%s1326_s22 + $0x28] sm:$0xff] %vm369_vm1, %v732_v13  ;;  %vm2140_vm8 = vcmp.gt.f32.partialorder %v1599_v39, %v1844_v28  ;;  %v1861_v6 = vsel %vm2139_vm7, %v1796_v50, %v1829_v40  ;;  %v749_v26 = vadd.s32 4294967279, %v738_v52  ;;  %v522_v3 = vsel %vm514_vm5, 2, %v490_v41  ;;  %v2221_v27 = vld [vmem:[#allocation26_spill] sm:$0xff] }
  0x5b   : > { %v1871_v44 = vsel %vm2140_vm8, %v1599_v39, %v1844_v28  ;;  %vm2141_vm0 = vcmp.gt.f32.partialorder %v1831_v16, %v1861_v6  ;;  %vm2172_vm7 = vcmp.gt.f32.partialorder %v1369_v21, %v1307_v9  ;;  %v739_v52 = vadd.s32 64, %v1178_v22  ;;  %v2222_v59 = vld [vmem:[#allocation27_spill] sm:$0xff] }
  0x5c   : > { %v554_v54 = vsel %vm2172_vm7, 16, %v522_v3  ;;  %vm2142_vm5 = vcmp.gt.f32.partialorder %v1673_v19, %v1871_v44  ;;  %v1886_v0 = vsel %vm2141_vm0, %v1831_v16, %v1861_v6  ;;  %v765_v41 = vadd.s32 %v749_v26, %v720_v4  ;;  %v2225_v53 = vld [vmem:[#allocation28_spill] sm:$0xff] }
  0x5d   : > { %vm2173_vm8 = vcmp.gt.f32.partialorder %v1372_v23, %v1414_v34  ;;  %v733_v21 = vsel %vm2142_vm5, %v1673_v19, %v1871_v44  ;;  %vm2143_vm7 = vcmp.gt.f32.partialorder %v1888_v1, %v1886_v0  ;;  %vm2174_vm0 = vcmp.gt.f32.partialorder %v1456_v49, %v1454_v43  ;;  %v2226_v38 = vld [vmem:[#allocation29_spill] sm:$0xff] }
  0x5e   : > { %v593_v9 = vsel %vm2173_vm8, 17, %v554_v54  ;;  %v750_v13 = vadd.s32 4294967279, %v739_v52  ;;  %762 = vst.msk [vmem:[%s1326_s22 + $0x30] sm:$0xff] %vm369_vm1, %v733_v21  ;;  %v734_v26 = vsel %vm2143_vm7, %v1888_v1, %v1886_v0  ;;  %vm2175_vm8 = vcmp.gt.f32.partialorder %v1189_v30, %v1494_v60  ;;  %v2193_v21 = vld [vmem:[#allocation15_spill] sm:$0xff] }
  0x5f   : > { %v625_v3 = vsel %vm2174_vm0, 18, %v593_v9  ;;  %vm2176_vm5 = vcmp.gt.f32.partialorder %v1264_v62, %v1224_v46  ;;  %v740_v43 = vadd.s32 96, %v1178_v22  ;;  %763 = vst.msk [vmem:[%s1326_s22 + $0x38] sm:$0xff] %vm369_vm1, %v734_v26  ;;  %vm2177_vm0 = vcmp.gt.f32.partialorder %v1264_v62, %v1532_v8 }
  0x60   : > { %v657_v23 = vsel %vm2175_vm8, 32, %v625_v3  ;;  %v491_v34 = vsel %vm2176_vm5, 1, %v2166_v55  ;;  %vm2178_vm7 = vcmp.gt.f32.partialorder %v1309_v10, %v1316_v11  ;;  %vm2179_vm8 = vcmp.gt.f32.partialorder %v1283_v2, %v1227_v47  ;;  %773 = vst.msk [vmem:[%s1365_s25 + $0x8] sm:$0xff] %vm369_vm1, %v765_v41  ;;  %v2188_v41 = vld [vmem:[#allocation7_spill] sm:$0xff] }
  0x61   : > { %v689_v49 = vsel %vm2177_vm0, 33, %v657_v23  ;;  %v523_v4 = vsel %vm2178_vm7, 2, %v491_v34  ;;  %v492_v30 = vsel %vm2179_vm8, 1, %v2166_v55  ;;  %v741_v46 = vadd.s32 128, %v1178_v22  ;;  %v2196_v3 = vld [vmem:[#allocation11_spill] sm:$0xff]  ;;  %v2200_v34 = vld [vmem:[#allocation18_spill] sm:$0xff] }
  0x62   : > { %v721_v60 = vsel %vm713_vm9, 34, %v689_v49  ;;  %vm2180_vm5 = vcmp.gt.f32.partialorder %v1393_v29, %v1352_v18  ;;  %v751_v11 = vadd.s32 4294967279, %v740_v43  ;;  %vm2181_vm7 = vcmp.gt.f32.partialorder %v1331_v14, %v1338_v15  ;;  %v2185_v29 = vld [vmem:[#allocation13_spill] sm:$0xff]  ;;  %v2187_v15 = vld [vmem:[#allocation10_spill] sm:$0xff] }
  0x63   : > { %v555_v62 = vsel %vm2180_vm5, 16, %v523_v4  ;;  %v524_v8 = vsel %vm2181_vm7, 2, %v492_v30  ;;  %v766_v47 = vadd.s32 %v750_v13, %v721_v60  ;;  %vm2182_vm0 = vcmp.gt.f32.partialorder %v1396_v31, %v1443_v42  ;;  %v2202_v49 = vld [vmem:[#allocation6_spill] sm:$0xff]  ;;  %v2203_v4 = vld [vmem:[#allocation17_spill] sm:$0xff]  ;;  %v2206_v60 = vld [vmem:[#allocation23_spill] sm:$0xff] }
  0x64   : > { %v594_v54 = vsel %vm2182_vm0, 17, %v555_v62  ;;  %vm2183_vm8 = vcmp.gt.f32.partialorder %v1418_v36, %v1379_v24  ;;  %v752_v10 = vadd.s32 4294967279, %v741_v46  ;;  %vm2184_vm9 = vcmp.gt.f32.partialorder %v1483_v58, %v1481_v57  ;;  %v2190_v24 = vld [vmem:[#allocation5_spill] sm:$0xff]  ;;  %v2191_v36 = vld [vmem:[#allocation16_spill] sm:$0xff]  ;;  %v2194_v57 = vld [vmem:[#allocation14_spill] sm:$0xff] }
  0x65   : > { %v556_v52 = vsel %vm2183_vm8, 16, %v524_v8  ;;  %v626_v18 = vsel %vm2184_vm9, 18, %v594_v54  ;;  %vm2186_vm5 = vcmp.gt.f32.partialorder %v1421_v37, %v2185_v29  ;;  %vm2189_vm7 = vcmp.gt.f32.partialorder %v2187_v15, %v2188_v41  ;;  %774 = vst.msk [vmem:[%s1365_s25 + $0x10] sm:$0xff] %vm369_vm1, %v766_v47  ;;  %v2197_v37 = vld [vmem:[#allocation12_spill] sm:$0xff]  ;;  %v2208_v47 = vld [vmem:[#allocation21_spill] sm:$0xff] }
  0x66   : > { %v595_v20 = vsel %vm2186_vm5, 17, %v556_v52  ;;  %v493_v9 = vsel %vm2189_vm7, 1, %v2166_v55  ;;  %v742_v31 = vadd.s32 160, %v1178_v22  ;;  %vm2192_vm0 = vcmp.gt.f32.partialorder %v2190_v24, %v2191_v36  ;;  %v2205_v46 = vld [vmem:[#allocation20_spill] sm:$0xff]  ;;  %v2210_v52 = vld [vmem:[#allocation19_spill] sm:$0xff] }
  0x67   : > { %v658_v42 = vsel %vm2192_vm0, 32, %v626_v18  ;;  %vm2195_vm8 = vcmp.gt.f32.partialorder %v2193_v21, %v2194_v57  ;;  %vm2198_vm9 = vcmp.gt.f32.partialorder %v2196_v3, %v2197_v37  ;;  %v494_v23 = vsel %vm486_vm6, 1, %v2166_v55  ;;  %v2229_v21 = vld [vmem:[#allocation30_spill] sm:$0xff] }
  0x68   : > { %v627_v58 = vsel %vm2195_vm8, 18, %v595_v20  ;;  %v525_v13 = vsel %vm2198_vm9, 2, %v493_v9  ;;  %vm2201_vm5 = vcmp.gt.f32.partialorder %v1283_v2, %v2200_v34  ;;  %vm2204_vm7 = vcmp.gt.f32.partialorder %v2202_v49, %v2203_v4  ;;  %v2214_v9 = vld [vmem:[#allocation22_spill] sm:$0xff] }
  0x69   : > { %v690_v43 = vsel %vm2201_vm5, 33, %v658_v42  ;;  %v659_v30 = vsel %vm2204_vm7, 32, %v627_v58  ;;  %vm2207_vm0 = vcmp.gt.f32.partialorder %v2205_v46, %v2206_v60  ;;  %v753_v8 = vadd.s32 4294967279, %v742_v31  ;;  %v2228_v42 = vld [vmem:[#allocation31_spill] sm:$0xff] }
  0x6a   : > { %v557_v62 = vsel %vm2207_vm0, 16, %v525_v13  ;;  %vm2209_vm8 = vcmp.gt.f32.partialorder %v1331_v14, %v2208_v47  ;;  %vm2211_vm6 = vcmp.gt.f32.partialorder %v2187_v15, %v2210_v52  ;;  %vm2212_vm9 = vcmp.gt.f32.partialorder %v1625_v35, %v1652_v25 }
  0x6b   : > { %v722_v54 = vsel %vm2209_vm8, 34, %v690_v43  ;;  %v691_v18 = vsel %vm2211_vm6, 33, %v659_v30  ;;  %v596_v2 = vsel %vm2212_vm9, 17, %v557_v62  ;;  %v526_v20 = vsel %vm518_vm13, 2, %v494_v23 }
  0x6c   : > { %v767_v41 = vadd.s32 %v751_v11, %v722_v54  ;;  %vm2215_vm5 = vcmp.gt.f32.partialorder %v2196_v3, %v2214_v9  ;;  %v628_v14 = vsel %vm620_vm11, 18, %v596_v2  ;;  %v558_v15 = vsel %vm550_vm4, 16, %v526_v20 }
  0x6d   : > { %v723_v31 = vsel %vm2215_vm5, 34, %v691_v18  ;;  %v660_v25 = vsel %vm652_vm12, 32, %v628_v14  ;;  %v597_v11 = vsel %vm589_vm15, 17, %v558_v15  ;;  %v743_v24 = vadd.s32 192, %v1178_v22 }
  0x6e   : > { %v768_v35 = vadd.s32 %v752_v10, %v723_v31  ;;  %775 = vst.msk [vmem:[%s1365_s25 + $0x18] sm:$0xff] %vm369_vm1, %v767_v41  ;;  %v692_v7 = vsel %vm684_vm10, 33, %v660_v25  ;;  %v629_v56 = vsel %vm621_vm3, 18, %v597_v11  ;;  %vm2217_vm4 = vcmp.gt.f32.partialorder %v1599_v39, %v2216_v45 }
  0x6f   : > { %v495_v32 = vsel %vm2217_vm4, 1, %v2166_v55  ;;  %v744_v33 = vadd.s32 224, %v1178_v22  ;;  %v724_v51 = vsel %vm716_vm2, 34, %v692_v7  ;;  %v661_v63 = vsel %vm653_vm14, 32, %v629_v56 }
  0x70   : > { %776 = vst.msk [vmem:[%s1365_s25 + $0x20] sm:$0xff] %vm369_vm1, %v768_v35  ;;  %v754_v61 = vadd.s32 4294967279, %v743_v24  ;;  %vm2219_vm11 = vcmp.gt.f32.partialorder %v1673_v19, %v2218_v5  ;;  %v769_v55 = vadd.s32 %v753_v8, %v724_v51  ;;  %vm2220_vm13 = vcmp.gt.f32.partialorder %v1599_v39, %v1844_v28 }
  0x71   : > { %v527_v17 = vsel %vm2219_vm11, 2, %v495_v32  ;;  %v693_v22 = vsel %vm2220_vm13, 33, %v661_v63  ;;  %vm2223_vm15 = vcmp.gt.f32.partialorder %v2221_v27, %v2222_v59  ;;  %vm2224_vm3 = vcmp.gt.f32.partialorder %v1673_v19, %v1871_v44 }
  0x72   : > { %v559_v12 = vsel %vm2223_vm15, 16, %v527_v17  ;;  %v725_v48 = vsel %vm2224_vm3, 34, %v693_v22  ;;  %vm2227_vm12 = vcmp.gt.f32.partialorder %v2225_v53, %v2226_v38  ;;  %777 = vst.msk [vmem:[%s1365_s25 + $0x28] sm:$0xff] %vm369_vm1, %v769_v55  ;;  %vm2230_vm14 = vcmp.gt.f32.partialorder %v2228_v42, %v2229_v21 }
  0x73   : > { %v598_v10 = vsel %vm2227_vm12, 17, %v559_v12  ;;  %v770_v36 = vadd.s32 %v754_v61, %v725_v48  ;;  %v755_v28 = vadd.s32 4294967279, %v744_v33  ;;  %vm2231_vm10 = vcmp.gt.f32.partialorder %v1796_v50, %v1829_v40 }
  0x74   : > { %v630_v39 = vsel %vm2230_vm14, 18, %v598_v10  ;;  %vm2232_vm2 = vcmp.gt.f32.partialorder %v1831_v16, %v1861_v6  ;;  %vm2233_vm7 = vcmp.gt.f32.partialorder %v1888_v1, %v1886_v0 }
  0x75   : > { %v662_v57 = vsel %vm2231_vm10, 32, %v630_v39  ;;  %778 = vst.msk [vmem:[%s1365_s25 + $0x30] sm:$0xff] %vm369_vm1, %v770_v36 }
  0x76   : > { %v694_v19 = vsel %vm2232_vm2, 33, %v662_v57 }
  0x77   : > { %v726_v44 = vsel %vm2233_vm7, 34, %v694_v19 }
  0x78   : > { %v771_v58 = vadd.s32 %v755_v28, %v726_v44 }
  0x7a   : > { %779 = vst.msk [vmem:[%s1365_s25 + $0x38] sm:$0xff] %vm369_vm1, %v771_v58 }
  0x7b PF: > { %s14_s14 = sadd.s32 1, %s1084_s14   ;;  %s2234_s12 = smov %s1080_s13 }
  0x7c   : > { %p11_p5 = scmp.ge.s32.totalorder %s14_s14, 4   ;;  %s2235_s13 = smov %s2237_s1 }
  0x7e   :  { %13 = sbr.rel (!%p11_p5) target bundleno = 2 (0x2), region = 107 }

</bundles_post_ra>
